<compile_context>
chip_gen: v5e
topology: v5e:2x2
jax: 0.10.0
libtpu: 0.0.40
codegen_flags: <defaults>
</compile_context>

<pallas_src>
import functools

import jax
import jax.numpy as jnp
from jax.experimental import pallas as pl
from jax.experimental.pallas import tpu as pltpu


def _triplet_tile_kernel(a_ref, p_ref, n_ref, o_ref, *, margin, batch, tile_rows):
    i = pl.program_id(0)

    a = a_ref[...]
    dp = a - p_ref[...]
    dn = a - n_ref[...]

    # Squared L2 distances reduced over the feature (lane) axis.
    pos = jnp.sqrt(jnp.sum(dp * dp, axis=-1, keepdims=True))   # (TB, 1)
    neg = jnp.sqrt(jnp.sum(dn * dn, axis=-1, keepdims=True))   # (TB, 1)
    loss = jnp.maximum(0.0, margin + pos - neg)                # (TB, 1)

    # Mask rows past the true batch size (tail tile reads unspecified data).
    row = jax.lax.broadcasted_iota(jnp.int32, (tile_rows, 1), 0) + i * tile_rows
    loss = jnp.where(row < batch, loss, 0.0)

    tile_sum = jnp.sum(loss)
    # Lane-dense (8, 128) partial-sum block; mean is finished in the wrapper.
    o_ref[...] = jnp.full((1, 8, 128), tile_sum, dtype=jnp.float32)


def _round_up(x, m):
    return ((x + m - 1) // m) * m


def _choose_tile_rows(batch, feat, vmem_budget_bytes=24 * 1024 * 1024):
    # 3 inputs x 2 pipeline buffers x TB x D x 4B must fit the VMEM budget.
    tb = vmem_budget_bytes // (3 * 2 * feat * 4)
    tb = max(8, min(tb, 512))
    tb = (tb // 8) * 8
    return min(tb, _round_up(batch, 8))


def triplet_margin_loss(anchor, positive, negative, margin=1.0, tile_rows=None):
    """anchor/positive/negative: (B, D) float32. Returns scalar float32."""
    assert anchor.shape == positive.shape == negative.shape
    assert anchor.ndim == 2
    B, D = anchor.shape

    tb = tile_rows if tile_rows is not None else _choose_tile_rows(B, D)
    assert tb % 8 == 0, "tile_rows must be a multiple of 8 (sublane granularity)"
    num_tiles = pl.cdiv(B, tb)

    kernel = functools.partial(
        _triplet_tile_kernel, margin=float(margin), batch=B, tile_rows=tb
    )

    # 3 inputs x 2 pipeline buffers x tile, plus slack; cap below v7x's 64 MiB.
    vmem_bytes = 3 * 2 * tb * D * 4 + (2 << 20)
    vmem_limit = int(min(max(vmem_bytes, 16 << 20), 48 << 20))

    partial_sums = pl.pallas_call(
        kernel,
        out_shape=jax.ShapeDtypeStruct((num_tiles, 8, 128), jnp.float32),
        grid_spec=pltpu.PrefetchScalarGridSpec(
            num_scalar_prefetch=0,
            grid=(num_tiles,),
            in_specs=[
                pl.BlockSpec((tb, D), lambda i: (i, 0)),
                pl.BlockSpec((tb, D), lambda i: (i, 0)),
                pl.BlockSpec((tb, D), lambda i: (i, 0)),
            ],
            out_specs=pl.BlockSpec((1, 8, 128), lambda i: (i, 0, 0)),
        ),
        compiler_params=pltpu.CompilerParams(
            dimension_semantics=("parallel",),
            vmem_limit_bytes=vmem_limit,
        ),
    )(anchor, positive, negative)

    # Each tile's sum is replicated across its (8, 128) block; take one
    # representative per tile and finish the mean with a constant multiply.
    return jnp.sum(partial_sums[:, 0, 0]) * jnp.float32(1.0 / B)


def _reference(anchor, positive, negative, margin):
    pos = jnp.sqrt(jnp.sum((anchor - positive) ** 2, axis=-1))
    neg = jnp.sqrt(jnp.sum((anchor - negative) ** 2, axis=-1))
    return jnp.mean(jnp.maximum(0.0, margin + pos - neg))


if __name__ == "__main__":
    key = jax.random.PRNGKey(0)
    k1, k2, k3 = jax.random.split(key, 3)

    # Small shapes consistent with the module (real workload is (B, 4096)).
    # Case 1: B not a multiple of the tile -> exercises tiling + tail masking.
    B, D = 50, 256
    anchor = jax.random.normal(k1, (B, D), dtype=jnp.float32)
    positive = jax.random.normal(k2, (B, D), dtype=jnp.float32)
    negative = jax.random.normal(k3, (B, D), dtype=jnp.float32)

    loss = triplet_margin_loss(anchor, positive, negative, margin=1.0, tile_rows=16)
    jax.block_until_ready(loss)
    ref = _reference(anchor, positive, negative, 1.0)
    assert jnp.allclose(loss, ref, rtol=1e-5, atol=1e-5), (loss, ref)

    # Case 2: auto tile selection, B a multiple of 8 -> single full block.
    B2, D2 = 64, 256
    a2 = jax.random.normal(k1, (B2, D2), dtype=jnp.float32)
    p2 = jax.random.normal(k2, (B2, D2), dtype=jnp.float32)
    n2 = jax.random.normal(k3, (B2, D2), dtype=jnp.float32)

    loss2 = triplet_margin_loss(a2, p2, n2, margin=1.0)
    jax.block_until_ready(loss2)
    ref2 = _reference(a2, p2, n2, 1.0)
    assert jnp.allclose(loss2, ref2, rtol=1e-5, atol=1e-5), (loss2, ref2)

    print("KERNEL_OK")
</pallas_src>

<mosaic_0001>
module attributes {stable_mosaic.version = 11 : i64} {
  func.func @_triplet_tile_kernel(%arg0: i32, %arg1: memref<16x256xf32, #tpu.memory_space<vmem>>, %arg2: memref<16x256xf32, #tpu.memory_space<vmem>>, %arg3: memref<16x256xf32, #tpu.memory_space<vmem>>, %arg4: memref<1x8x128xf32, #tpu.memory_space<vmem>>) attributes {dimension_semantics = [#tpu.dimension_semantics<parallel>], iteration_bounds = array<i64: 4>, scalar_prefetch = 0 : i64, scratch_operands = 0 : i64, tpu.core_type = #tpu.core_type<tc>, window_params = [{transform_indices = @transform_0, window_bounds = array<i64: 16, 256>}, {transform_indices = @transform_1, window_bounds = array<i64: 16, 256>}, {transform_indices = @transform_2, window_bounds = array<i64: 16, 256>}, {transform_indices = @transform_3, window_bounds = array<i64: 1, 8, 128>}]} {
    %c0 = arith.constant 0 : index
    %c0_0 = arith.constant 0 : index
    %0 = vector.load %arg1[%c0, %c0_0] : memref<16x256xf32, #tpu.memory_space<vmem>>, vector<16x256xf32>
    %c0_1 = arith.constant 0 : index
    %c0_2 = arith.constant 0 : index
    %1 = vector.load %arg2[%c0_1, %c0_2] : memref<16x256xf32, #tpu.memory_space<vmem>>, vector<16x256xf32>
    %2 = arith.subf %0, %1 : vector<16x256xf32>
    %c0_3 = arith.constant 0 : index
    %c0_4 = arith.constant 0 : index
    %3 = vector.load %arg3[%c0_3, %c0_4] : memref<16x256xf32, #tpu.memory_space<vmem>>, vector<16x256xf32>
    %4 = arith.subf %0, %3 : vector<16x256xf32>
    %5 = arith.mulf %2, %2 : vector<16x256xf32>
    %cst = arith.constant dense<0.000000e+00> : vector<16xf32>
    %6 = vector.multi_reduction <add>, %5, %cst [1] : vector<16x256xf32> to vector<16xf32>
    %7 = vector.shape_cast %6 : vector<16xf32> to vector<16x1xf32>
    %8 = math.sqrt %7 : vector<16x1xf32>
    %9 = arith.mulf %4, %4 : vector<16x256xf32>
    %cst_5 = arith.constant dense<0.000000e+00> : vector<16xf32>
    %10 = vector.multi_reduction <add>, %9, %cst_5 [1] : vector<16x256xf32> to vector<16xf32>
    %11 = vector.shape_cast %10 : vector<16xf32> to vector<16x1xf32>
    %12 = math.sqrt %11 : vector<16x1xf32>
    %cst_6 = arith.constant 1.000000e+00 : f32
    %13 = vector.broadcast %cst_6 : f32 to vector<16x1xf32>
    %14 = arith.addf %13, %8 : vector<16x1xf32>
    %15 = arith.subf %14, %12 : vector<16x1xf32>
    %cst_7 = arith.constant 0.000000e+00 : f32
    %16 = vector.broadcast %cst_7 : f32 to vector<16x1xf32>
    %17 = arith.maximumf %16, %15 : vector<16x1xf32>
    %18 = tpu.iota {dimensions = array<i32: 0>} : vector<16x1xi32>
    %c16_i32 = arith.constant 16 : i32
    %19 = arith.muli %arg0, %c16_i32 : i32
    %20 = vector.broadcast %19 : i32 to vector<16x1xi32>
    %21 = arith.addi %18, %20 : vector<16x1xi32>
    %c50_i32 = arith.constant 50 : i32
    %22 = vector.broadcast %c50_i32 : i32 to vector<16x1xi32>
    %23 = arith.cmpi slt, %21, %22 : vector<16x1xi32>
    %cst_8 = arith.constant 0.000000e+00 : f32
    %24 = vector.broadcast %cst_8 : f32 to vector<16x1xf32>
    %25 = arith.select %23, %17, %24 : vector<16x1xi1>, vector<16x1xf32>
    %26 = vector.shape_cast %25 : vector<16x1xf32> to vector<1x16x1xf32>
    %cst_9 = arith.constant dense<0.000000e+00> : vector<1xf32>
    %27 = vector.multi_reduction <add>, %26, %cst_9 [1, 2] : vector<1x16x1xf32> to vector<1xf32>
    %28 = vector.shape_cast %27 : vector<1xf32> to vector<1x1x1xf32>
    %29 = vector.extract %28[0, 0, 0] : f32 from vector<1x1x1xf32>
    %30 = vector.broadcast %29 : f32 to vector<1x8x128xf32>
    %c0_10 = arith.constant 0 : index
    %c0_11 = arith.constant 0 : index
    %c0_12 = arith.constant 0 : index
    %31 = vector.load %arg4[%c0_10, %c0_11, %c0_12] : memref<1x8x128xf32, #tpu.memory_space<vmem>>, vector<1x8x128xf32>
    tpu.vector_store %arg4[%c0_10, %c0_11, %c0_12], %30 {strides = array<i32>} : memref<1x8x128xf32, #tpu.memory_space<vmem>>, vector<1x8x128xf32>,
    return
  }
  func.func @transform_0(%arg0: i32) -> (i32, i32) {
    %c0_i32 = arith.constant 0 : i32
    %c0_i32_0 = arith.constant 0 : i32
    return %arg0, %c0_i32 : i32, i32
  }
  func.func @transform_1(%arg0: i32) -> (i32, i32) {
    %c0_i32 = arith.constant 0 : i32
    %c0_i32_0 = arith.constant 0 : i32
    return %arg0, %c0_i32 : i32, i32
  }
  func.func @transform_2(%arg0: i32) -> (i32, i32) {
    %c0_i32 = arith.constant 0 : i32
    %c0_i32_0 = arith.constant 0 : i32
    return %arg0, %c0_i32 : i32, i32
  }
  func.func @transform_3(%arg0: i32) -> (i32, i32, i32) {
    %c0_i32 = arith.constant 0 : i32
    %c0_i32_0 = arith.constant 0 : i32
    %c0_i32_1 = arith.constant 0 : i32
    return %arg0, %c0_i32, %c0_i32_0 : i32, i32, i32
  }
}

</mosaic_0001>

<bundles_post_ra>
// kernel: tpu_custom_call.1
= control target key start
LH: loop header
LB: loop body
LE: loop exit
PB: predicated region body
PF: predicated region fallthrough
CT: control target
= control target key end

     0   :  { %8 = vsyncpa [#allocation3], 0  ;;  %s1141_s0 = inlined_call_operand.hbm [shape: f32[50,256], index: 0, kind: input, shape index: {}]   ;;  %s1142_s1 = inlined_call_operand.hbm [shape: f32[50,256], index: 1, kind: input, shape index: {}]   ;;  %s1143_s2 = inlined_call_operand.hbm [shape: f32[50,256], index: 2, kind: input, shape index: {}]   ;;  %s1144_s3 = inlined_call_operand.hbm [shape: f32[4,8,128], index: 3, kind: output, shape index: {}]  }
   0x1   :  { %10 = vsyncpa [#allocation3 + $0x1], 0 }
   0x2   :  { %11 = vsyncpa [#allocation6], 0 }
   0x3   :  { %13 = vsyncpa [#allocation6 + $0x1], 0 }
   0x4   :  { %14 = vsyncpa [#allocation4], 0 }
   0x5   :  { %16 = vsyncpa [#allocation4 + $0x1], 0  ;;  %s891_s12 = smov 0   ;;  %s893_s13 = smov 0  }
   0x6   :  { %s895_s14 = smov 0   ;;  %s897_s15 = smov 0  }
   0x7 LB: > { %s912_s16 = sadd.s32 4294967295, %s860_s15   ;;  %s566_s17 = sadd.s32 4294967294, %s860_s15   ;;  %s860_s15 = sphi %s897_s15, %s1156_s15   ;;  %s856_s14 = sphi %s895_s14, %s1155_s14   ;;  %s852_s13 = sphi %s893_s13, %s1154_s13   ;;  %s848_s12 = sphi %s891_s12, %s1153_s12  }
   0x8   : > { %s916_s18 = sadd.s32 1, %s860_s15   ;;  %s29_s19 = sadd.s32 1, %s856_s14 }
   0x9   : > { %s26_s20 = ssub.s32 %s860_s15, %s916_s18  ;;  %p36_p0 = scmp.ne.s32.totalorder %s856_s14, %s852_s13 }
   0xa   : > { %p27_p1 = scmp.eq.s32.totalorder %s26_s20, 0  ;;  %p37_p2 = scmp.eq.s32.totalorder %s860_s15, 0 }
   0xb   : > { %p42_p3 = scmp.ne.s32.totalorder %s852_s13, %s848_s12  ;;  %p43_p4 = scmp.eq.s32.totalorder %s912_s16, 0 }
   0xc   : > { %s928_s21 = scalar_select %p27_p1, %s856_s14, %s29_s19  }
   0xd   : > { %p930_p5 = por %p37_p2, %p36_p0  ;;  %p934_p6 = por %p43_p4, %p42_p3 }
   0xe   : > { %p118_p7 = scmp.eq.s32.totalorder %s912_s16, 3  ;;  %p124_p8 = scmp.eq.s32.totalorder %s566_s17, 3 }
   0xf   : > { %p568_p11 = scmp.ge.s32.totalorder %s860_s15, 4 }
  0x10   : > { %p939_p9 = por %p118_p7, %p36_p0  ;;  %p943_p10 = por %p124_p8, %p42_p3 }
  0x11   : > { %140 = sbr.rel (%p568_p11) target bundleno = 130 (0x82), region = 16 }
  0x12   : > { %s1148_s25 = scalar_select %p943_p10, 1, 0 }
  0x16   : > { %143 = sbr.rel (!%p930_p5) target bundleno = 58 (0x3a), region = 20  ;;  %s144_s26 = sand.u32 (%p930_p5), 1, %s856_s14  }
  0x17   : > { %s570_s27 = sshll.u32 (%p930_p5), %s860_s15, 1  ;;  %s569_s28 = sshll.u32 (%p930_p5), %s144_s26, 5 }
  0x18   : > { %s150_s29 = ssub.s32 (%p930_p5), 7, %s570_s27  ;;  %s955_s6 = scalar_lea.sflag (%p930_p5), [#allocation3], %s144_s26 }
  0x19   : > { %p151_p12 = scmp.lt.s32.totalorder (%p930_p5), %s150_s29, 2  ;;  %s148_s7 = scalar_lea.vmem (%p930_p5), [#allocation2], %s569_s28 }
  0x1b   : > { %s1158_s29 = smov (!%p151_p12, %s150_s29), 2 }
  0x1c   : > { %s606_s30 = sshll.u32 %s1158_s29, 4 }
  0x1d   : > { %s155_s4 = ssub.s32 32, %s606_s30 }
  0x1e   : > { %s156_s5 = sshll.u32 %s155_s4, 4 }
  0x1f   : > { %157 = vsyncadd %s955_s6, %s156_s5  ;;  %p958_p13 = scmp.ne.s32.totalorder %s606_s30, 0  ;;  %s608_s9 = sshll.u32 %s860_s15, 5 }
  0x20   : > { %s161_s17 = scalar_lea.hbm %s1141_s0, %s608_s9  ;;  %s966_s19 = sshll.u32 %s148_s7, 4  ;;  %s166_s19 = int_to_ptr.vmem [resolvable:$true] %s966_s19 }
  0x21   : > { %s163_s20 = sshll.u32 %s161_s17, 4  ;;  %s577_s26 = sshll.u32 %s1158_s29, 8  ;;  %s969_s20 = int_to_ptr.hbm [resolvable:$true] %s163_s20 }
  0x22   : > { %s673_s27 = sshra.s32 %s969_s20, 4  ;;  %s675_s28 = sshrl.u32 %s577_s26, 4  ;;  %s674_s27 = int_to_ptr.hbm [resolvable:$true] %s673_s27 }
  0x23   : > { %s680_s30 = scalar_lea.hbm %s674_s27, %s675_s28  ;;  %s684_s7 = scalar_lea.hbm %s1141_s0, 112 }
  0x24   : > { %p681_p0 = scmp.ne.s32.totalorder %s674_s27, %s680_s30  ;;  %p685_p3 = scmp.lt.s32.totalorder %s674_s27, %s1141_s0 }
  0x25   : > { %p686_p4 = scmp.lt.s32.totalorder %s684_s7, %s680_s30 }
  0x26   : > { %p682_p1 = pnand %p681_p0, %p958_p13 }
  0x27   : > { %p687_p7 = por %p686_p4, %p685_p3 }
  0x28   : > { %p683_p2 = pneg %p682_p1 }
  0x2a   : > { %p688_p8 = pnand %p687_p7, %p683_p2 }
  0x2c   : > { %691 = shalt.err (!%p688_p8)
}
  0x2d   : > { %s692_s11 = sshra.s32 %s166_s19, 4  ;;  %s862_s4 = smov [#allocation2]   ;;  %s693_s11 = int_to_ptr.vmem [resolvable:$true] %s692_s11 }
  0x2e   : > { %s699_s17 = scalar_lea.vmem %s693_s11, %s675_s28  ;;  %s703_s5 = scalar_lea.vmem %s862_s4, 64 }
  0x2f   : > { %p700_p11 = scmp.ne.s32.totalorder %s693_s11, %s699_s17  ;;  %p705_p1 = scmp.lt.s32.totalorder %s703_s5, %s699_s17 }
  0x31   : > { %p701_p12 = pnand %p700_p11, %p958_p13 }
  0x33   : > { %p702_p0 = pneg %p701_p12 }
  0x35   : > { %p707_p10 = pnand %p705_p1, %p702_p0 }
  0x37   : > { %710 = shalt.err (!%p707_p10)
}
  0x38   : > { %s863_s27 = smov 256   ;;  %s864_s30 = smov 16  }
  0x39   : > { %171 = dma.hbm_to_vmem [thread:$0]  (%p958_p13), %s969_s20, %s577_s26, %s166_s19, %s955_s6, %s863_s27, %s863_s27, %s864_s30  }
  0x3a PF: > { %174 = sbr.rel (!%p930_p5) target bundleno = 94 (0x5e), region = 24  ;;  %s175_s28 = sand.u32 (%p930_p5), 1, %s860_s15  }
  0x3b   : > { %s177_s7 = sand.u32 (%p930_p5), 1, %s856_s14   ;;  %s579_s10 = sshll.u32 (%p930_p5), %s860_s15, 1 }
  0x3c   : > { %s578_s9 = sshll.u32 (%p930_p5), %s177_s7, 5  ;;  %s181_s11 = ssub.s32 (%p930_p5), 7, %s579_s10 }
  0x3d   : > { %p182_p10 = scmp.lt.s32.totalorder (%p930_p5), %s181_s11, 2  ;;  %s1003_s6 = scalar_lea.sflag (%p930_p5), [#allocation6], %s175_s28 }
  0x3e   : > { %s179_s19 = scalar_lea.vmem (%p930_p5), [#allocation5], %s578_s9 }
  0x3f   : > { %s1160_s11 = smov (!%p182_p10, %s181_s11), 2 }
  0x40   : > { %s609_s8 = sshll.u32 %s1160_s11, 4 }
  0x41   : > { %s186_s17 = ssub.s32 32, %s609_s8 }
  0x42   : > { %s187_s29 = sshll.u32 %s186_s17, 4 }
  0x43   : > { %188 = vsyncadd %s1003_s6, %s187_s29  ;;  %p1006_p13 = scmp.ne.s32.totalorder %s609_s8, 0  ;;  %s611_s26 = sshll.u32 %s860_s15, 5 }
  0x44   : > { %s192_s27 = scalar_lea.hbm %s1142_s1, %s611_s26  ;;  %s1014_s30 = sshll.u32 %s179_s19, 4  ;;  %s197_s30 = int_to_ptr.vmem [resolvable:$true] %s1014_s30 }
  0x45   : > { %s194_s28 = sshll.u32 %s192_s27, 4  ;;  %s586_s7 = sshll.u32 %s1160_s11, 8  ;;  %s1017_s28 = int_to_ptr.hbm [resolvable:$true] %s194_s28 }
  0x46   : > { %s712_s9 = sshra.s32 %s1017_s28, 4  ;;  %s714_s10 = sshrl.u32 %s586_s7, 4  ;;  %s713_s9 = int_to_ptr.hbm [resolvable:$true] %s712_s9 }
  0x47   : > { %s719_s8 = scalar_lea.hbm %s713_s9, %s714_s10  ;;  %s723_s19 = scalar_lea.hbm %s1142_s1, 112 }
  0x48   : > { %p720_p2 = scmp.ne.s32.totalorder %s713_s9, %s719_s8  ;;  %p724_p7 = scmp.lt.s32.totalorder %s713_s9, %s1142_s1 }
  0x49   : > { %p725_p8 = scmp.lt.s32.totalorder %s723_s19, %s719_s8 }
  0x4a   : > { %p721_p3 = pnand %p720_p2, %p1006_p13 }
  0x4b   : > { %p726_p11 = por %p725_p8, %p724_p7 }
  0x4c   : > { %p722_p4 = pneg %p721_p3 }
  0x4e   : > { %p727_p12 = pnand %p726_p11, %p722_p4 }
  0x50   : > { %730 = shalt.err (!%p727_p12)
}
  0x51   : > { %s731_s5 = sshra.s32 %s197_s30, 4  ;;  %s865_s17 = smov [#allocation5]   ;;  %s732_s5 = int_to_ptr.vmem [resolvable:$true] %s731_s5 }
  0x52   : > { %s738_s27 = scalar_lea.vmem %s732_s5, %s714_s10  ;;  %s742_s29 = scalar_lea.vmem %s865_s17, 64 }
  0x53   : > { %p739_p0 = scmp.ne.s32.totalorder %s732_s5, %s738_s27  ;;  %p744_p2 = scmp.lt.s32.totalorder %s742_s29, %s738_s27 }
  0x55   : > { %p740_p1 = pnand %p739_p0, %p1006_p13 }
  0x57   : > { %p741_p10 = pneg %p740_p1 }
  0x59   : > { %p746_p3 = pnand %p744_p2, %p741_p10 }
  0x5b   : > { %749 = shalt.err (!%p746_p3)
}
  0x5c   : > { %s866_s9 = smov 256   ;;  %s867_s8 = smov 16  }
  0x5d   : > { %202 = dma.hbm_to_vmem [thread:$0]  (%p1006_p13), %s1017_s28, %s586_s7, %s197_s30, %s1003_s6, %s866_s9, %s866_s9, %s867_s8  }
  0x5e PF: > { %205 = sbr.rel (!%p930_p5) target bundleno = 130 (0x82), region = 28  ;;  %s206_s10 = sand.u32 (%p930_p5), 1, %s860_s15  }
  0x5f   : > { %s208_s19 = sand.u32 (%p930_p5), 1, %s856_s14   ;;  %s588_s4 = sshll.u32 (%p930_p5), %s860_s15, 1 }
  0x60   : > { %s587_s26 = sshll.u32 (%p930_p5), %s208_s19, 5  ;;  %s212_s5 = ssub.s32 (%p930_p5), 7, %s588_s4 }
  0x61   : > { %p213_p4 = scmp.lt.s32.totalorder (%p930_p5), %s212_s5, 2  ;;  %s1051_s6 = scalar_lea.sflag (%p930_p5), [#allocation6], %s206_s10 }
  0x62   : > { %s210_s22 = scalar_lea.vmem (%p930_p5), [#allocation7], %s587_s26 }
  0x63   : > { %s1162_s5 = smov (!%p213_p4, %s212_s5), 2 }
  0x64   : > { %s612_s20 = sshll.u32 %s1162_s5, 4 }
  0x65   : > { %s217_s27 = ssub.s32 32, %s612_s20 }
  0x66   : > { %s218_s11 = sshll.u32 %s217_s27, 4 }
  0x67   : > { %219 = vsyncadd %s1051_s6, %s218_s11  ;;  %p1054_p5 = scmp.ne.s32.totalorder %s612_s20, 0  ;;  %s614_s28 = sshll.u32 %s860_s15, 5 }
  0x68   : > { %s223_s29 = scalar_lea.hbm %s1143_s2, %s614_s28  ;;  %s1062_s9 = sshll.u32 %s210_s22, 4  ;;  %s228_s9 = int_to_ptr.vmem [resolvable:$true] %s1062_s9 }
  0x69   : > { %s225_s8 = sshll.u32 %s223_s29, 4  ;;  %s595_s10 = sshll.u32 %s1162_s5, 8  ;;  %s1065_s8 = int_to_ptr.hbm [resolvable:$true] %s225_s8 }
  0x6a   : > { %s751_s19 = sshra.s32 %s1065_s8, 4  ;;  %s753_s26 = sshrl.u32 %s595_s10, 4  ;;  %s752_s19 = int_to_ptr.hbm [resolvable:$true] %s751_s19 }
  0x6b   : > { %s758_s4 = scalar_lea.hbm %s752_s19, %s753_s26  ;;  %s762_s11 = scalar_lea.hbm %s1143_s2, 112 }
  0x6c   : > { %p759_p13 = scmp.ne.s32.totalorder %s752_s19, %s758_s4  ;;  %p763_p11 = scmp.lt.s32.totalorder %s752_s19, %s1143_s2 }
  0x6d   : > { %p764_p12 = scmp.lt.s32.totalorder %s762_s11, %s758_s4 }
  0x6e   : > { %p760_p7 = pnand %p759_p13, %p1054_p5 }
  0x6f   : > { %p765_p0 = por %p764_p12, %p763_p11 }
  0x70   : > { %p761_p8 = pneg %p760_p7 }
  0x72   : > { %p766_p1 = pnand %p765_p0, %p761_p8 }
  0x74   : > { %769 = shalt.err (!%p766_p1)
}
  0x75   : > { %s770_s7 = sshra.s32 %s228_s9, 4  ;;  %s868_s29 = smov [#allocation7]   ;;  %s771_s7 = int_to_ptr.vmem [resolvable:$true] %s770_s7 }
  0x76   : > { %s777_s17 = scalar_lea.vmem %s771_s7, %s753_s26  ;;  %s781_s20 = scalar_lea.vmem %s868_s29, 64 }
  0x77   : > { %p778_p10 = scmp.ne.s32.totalorder %s771_s7, %s777_s17  ;;  %p783_p4 = scmp.lt.s32.totalorder %s781_s20, %s777_s17 }
  0x79   : > { %p779_p2 = pnand %p778_p10, %p1054_p5 }
  0x7b   : > { %p780_p3 = pneg %p779_p2 }
  0x7d   : > { %p785_p13 = pnand %p783_p4, %p780_p3 }
  0x7f   : > { %788 = shalt.err (!%p785_p13)
}
  0x80   : > { %s869_s19 = smov 256   ;;  %s870_s4 = smov 16  }
  0x81   : > { %233 = dma.hbm_to_vmem [thread:$0]  (%p1054_p5), %s1065_s8, %s595_s10, %s228_s9, %s1051_s6, %s869_s19, %s869_s19, %s870_s4  }
  0x82 PF: > { %p596_p7 = scmp.ge.s32.totalorder %s860_s15, 1  ;;  %p235_p8 = scmp.lt.s32.totalorder %s860_s15, 5 }
  0x84   : > { %p236_p11 = pnand %p596_p7, %p235_p8 }
  0x85   : > { %s1094_s26 = sand.u32 (!%p236_p11), 1, %s852_s13  }
  0x86   : > { %239 = sbr.rel (%p236_p11) target bundleno = 489 (0x1e9), region = 32  ;;  %s597_s27 = sshll.u32 (!%p236_p11), %s1094_s26, 5 }
  0x87   : > { %s242_s11 = scalar_lea.sflag (!%p236_p11), [#allocation3], %s1094_s26  ;;  %s245_s30 = scalar_lea.vmem (!%p236_p11), [#allocation2], %s597_s27 }
  0x8b   : > { %835 = dma.done.wait (%p934_p6), %s242_s11, 512  }
  0x8c   : > { %837 = vsyncadd (%p934_p6), %s242_s11, 4294966784  ;;  %s251_s5 = sand.u32 1, %s912_s16   ;;  %s255_s9 = scalar_lea.vmem [#allocation5], %s597_s27 }
  0x8d   : > { %s252_s6 = scalar_lea.sflag [#allocation6], %s251_s5 }
  0x8e   : > { %839 = dma.done.wait (%p934_p6), %s252_s6, 1024  }
  0x8f   : > { %841 = vsyncadd (%p934_p6), %s252_s6, 4294966272  ;;  %v317_v0 = vld [vmem:[%s245_s30] sm:$0xff]  ;;  %v318_v1 = vld [vmem:[%s245_s30 + $0x8] sm:$0xff]  ;;  %s265_s8 = scalar_lea.vmem [#allocation7], %s597_s27  ;;  %v411_v58 = vlaneseq  ;;  %s601_s23 = sshll.u32 %s912_s16, 4  ;;  %vm422_vm10 = vcmask 7168  }
  0x90   : > { %v329_v2 = vld [vmem:[%s265_s8] sm:$0xff]  ;;  %v330_v3 = vld [vmem:[%s265_s8 + $0x8] sm:$0xff]  ;;  %v319_v10 = vld [vmem:[%s245_s30 + $0x10] sm:$0xff]  ;;  %s600_s10 = sshll.u32 %s1094_s26, 3  ;;  %s603_s22 = sshll.u32 %s912_s16, 3 }
  0x91   : > { %v333_v4 = vsub.f32 %v317_v0, %v329_v2  ;;  %v321_v5 = vld [vmem:[%s255_s9] sm:$0xff]  ;;  %v322_v6 = vld [vmem:[%s255_s9 + $0x8] sm:$0xff]  ;;  %v334_v7 = vsub.f32 %v318_v1, %v330_v3  ;;  %v320_v11 = vld [vmem:[%s245_s30 + $0x18] sm:$0xff]  ;;  %s448_s17 = scalar_lea.hbm %s1144_s3, %s603_s22  ;;  %s298_s29 = scalar_lea.vmem [#allocation8], %s600_s10 }
  0x92   : > { %v325_v8 = vsub.f32 %v317_v0, %v321_v5  ;;  %v326_v9 = vsub.f32 %v318_v1, %v322_v6  ;;  %v331_v12 = vld [vmem:[%s265_s8 + $0x10] sm:$0xff]  ;;  %v332_v14 = vld [vmem:[%s265_s8 + $0x18] sm:$0xff]  ;;  %v415_v6 = vstv %s601_s23  ;;  %s450_s20 = sshll.u32 %s298_s29, 4  ;;  %s452_s19 = sshll.u32 %s448_s17, 4  ;;  %s451_s20 = int_to_ptr.vmem [resolvable:$true] %s450_s20  ;;  %s453_s19 = int_to_ptr.hbm [resolvable:$true] %s452_s19 }
  0x93   : > { %v371_v13 = vmul.f32 %v333_v4, %v333_v4  ;;  %v335_v15 = vsub.f32 %v319_v10, %v331_v12  ;;  %v323_v16 = vld [vmem:[%s255_s9 + $0x10] sm:$0xff]  ;;  %v324_v17 = vld [vmem:[%s255_s9 + $0x18] sm:$0xff]  ;;  %v372_v18 = vmul.f32 %v334_v7, %v334_v7  ;;  %v336_v21 = vsub.f32 %v320_v11, %v332_v14  ;;  %s438_s27 = scalar_lea.sflag [#allocation4], %s1094_s26  ;;  %s804_s11 = sshra.s32 %s453_s19, 4  ;;  %s805_s11 = int_to_ptr.hbm [resolvable:$true] %s804_s11 }
  0x94   : > { %v337_v19 = vmul.f32 %v325_v8, %v325_v8  ;;  %v338_v20 = vmul.f32 %v326_v9, %v326_v9  ;;  %v327_v22 = vsub.f32 %v319_v10, %v323_v16  ;;  %v328_v23 = vsub.f32 %v320_v11, %v324_v17  ;;  %s806_s30 = scalar_lea.hbm %s805_s11, 8  ;;  %s810_s6 = scalar_lea.hbm %s1144_s3, 32 }
  0x95   : > { %v375_v24 = vadd.f32 %v372_v18, %v371_v13  ;;  %v373_v26 = vmul.f32 %v335_v15, %v335_v15  ;;  %v374_v27 = vmul.f32 %v336_v21, %v336_v21  ;;  %v412_v4 = vshrl.u32 %v411_v58, 7  ;;  %p807_p6 = scmp.ne.s32.totalorder %s805_s11, %s806_s30  ;;  %p811_p0 = scmp.lt.s32.totalorder %s805_s11, %s1144_s3 }
  0x96   : > { %v341_v25 = vadd.f32 %v338_v20, %v337_v19  ;;  %v339_v28 = vmul.f32 %v327_v22, %v327_v22  ;;  %v340_v29 = vmul.f32 %v328_v23, %v328_v23  ;;  %p812_p1 = scmp.lt.s32.totalorder %s810_s6, %s806_s30 }
  0x97   : > { %376 = vadd.xlane.f32.xlu1 %v375_v24  ;;  %v378_v30 = vadd.f32 %v374_v27, %v373_v26  ;;  %v413_v9 = vadd.s32 8, %v412_v4  ;;  %v416_v13 = vadd.s32 %v415_v6, %v412_v4  ;;  %p808_p5 = pnand %p807_p6, %p939_p9 }
  0x98   : > { %342 = vadd.xlane.f32.xlu0 %v341_v25  ;;  %v344_v31 = vadd.f32 %v340_v29, %v339_v28  ;;  %p813_p10 = por %p812_p1, %p811_p0 }
  0x99   : > { %v417_v18 = vadd.s32 %v415_v6, %v413_v9  ;;  %vm418_vm8 = vcmp.lt.s32.totalorder %v416_v13, 50  ;;  %p809_p12 = pneg %p808_p5 }
  0x9b   : > { %vm419_vm9 = vcmp.lt.s32.totalorder %v417_v18, 50  ;;  %p814_p2 = pnand %p813_p10, %p809_p12 }
  0x9f   : > { %379 = vadd.xlane.f32.xlu1 %v378_v30 }
  0xa0   : > { %345 = vadd.xlane.f32.xlu0 %v344_v31 }
 0x10a   : > { %v377_v32 = vpop.xlane.xlu1 %376 }
 0x10b   : > { %v343_v33 = vpop.xlane.xlu0 %342  ;;  %665 = vrsqrt.f32 %v377_v32  ;;  %vm388_vm2 = vcmp.eq.f32.partialorder %v377_v32, inf  ;;  %v391_v3 = vand.u32 2147483648, %v377_v32  ;;  %vm390_vm3 = vcmp.eq.f32.partialorder %v377_v32, 0.0 }
 0x10c   : > { %667 = vrsqrt.f32 %v343_v33  ;;  %vm354_vm0 = vcmp.eq.f32.partialorder %v343_v33, inf  ;;  %v357_v57 = vand.u32 2147483648, %v343_v33  ;;  %vm356_vm1 = vcmp.eq.f32.partialorder %v343_v33, 0.0 }
 0x111   : > { %v666_v34 = vpop.eup %665 }
 0x112   : > { %v668_v35 = vpop.eup %667  ;;  %v382_v36 = vmul.f32 %v666_v34, %v377_v32  ;;  %v380_v37 = vpop.xlane.xlu1 %379 }
 0x113   : > { %v346_v38 = vpop.xlane.xlu0 %345  ;;  %v348_v39 = vmul.f32 %v668_v35, %v343_v33  ;;  %669 = vrsqrt.f32 %v380_v37  ;;  %vm400_vm5 = vcmp.eq.f32.partialorder %v380_v37, inf  ;;  %v403_v17 = vand.u32 2147483648, %v380_v37 }
 0x114   : > { %671 = vrsqrt.f32 %v346_v38  ;;  %v383_v40 = vmul.f32 %v666_v34, %v382_v36  ;;  %vm366_vm4 = vcmp.eq.f32.partialorder %v346_v38, inf  ;;  %v369_v12 = vand.u32 2147483648, %v346_v38 }
 0x115   : > { %v349_v41 = vmul.f32 %v668_v35, %v348_v39  ;;  %vm368_vm6 = vcmp.eq.f32.partialorder %v346_v38, 0.0  ;;  %vm402_vm7 = vcmp.eq.f32.partialorder %v380_v37, 0.0 }
 0x116   : > { %v384_v42 = vmul.f32 0.5, %v383_v40 }
 0x117   : > { %v350_v43 = vmul.f32 0.5, %v349_v41 }
 0x118   : > { %v385_v44 = vsub.f32 1.5, %v384_v42 }
 0x119   : > { %v670_v45 = vpop.eup %669  ;;  %v351_v46 = vsub.f32 1.5, %v350_v43 }
 0x11a   : > { %v672_v47 = vpop.eup %671  ;;  %v394_v48 = vmul.f32 %v670_v45, %v380_v37  ;;  %v386_v49 = vmul.f32 %v666_v34, %v385_v44 }
 0x11b   : > { %v360_v50 = vmul.f32 %v672_v47, %v346_v38  ;;  %v352_v51 = vmul.f32 %v668_v35, %v351_v46 }
 0x11c   : > { %v395_v52 = vmul.f32 %v670_v45, %v394_v48  ;;  %v387_v55 = vmul.f32 %v386_v49, %v377_v32 }
 0x11d   : > { %v361_v53 = vmul.f32 %v672_v47, %v360_v50  ;;  %v353_v54 = vmul.f32 %v352_v51, %v343_v33 }
 0x11e   : > { %v396_v56 = vmul.f32 0.5, %v395_v52  ;;  %v389_v0 = vsel %vm388_vm2, %v377_v32, %v387_v55 }
 0x11f   : > { %v362_v59 = vmul.f32 0.5, %v361_v53  ;;  %v355_v60 = vsel %vm354_vm0, %v343_v33, %v353_v54  ;;  %v392_v8 = vsel %vm390_vm3, %v391_v3, %v389_v0 }
 0x120   : > { %v397_v61 = vsub.f32 1.5, %v396_v56  ;;  %v358_v62 = vsel %vm356_vm1, %v357_v57, %v355_v60 }
 0x121   : > { %v363_v63 = vsub.f32 1.5, %v362_v59  ;;  %v405_v1 = vadd.f32 1.0, %v358_v62 }
 0x122   : > { %v398_v2 = vmul.f32 %v670_v45, %v397_v61 }
 0x123   : > { %v364_v5 = vmul.f32 %v672_v47, %v363_v63  ;;  %v407_v11 = vsub.f32 %v405_v1, %v392_v8 }
 0x124   : > { %v399_v7 = vmul.f32 %v398_v2, %v380_v37 }
 0x125   : > { %v365_v10 = vmul.f32 %v364_v5, %v346_v38  ;;  %v409_v20 = vmax.f32 %v407_v11, 0.0 }
 0x126   : > { %v401_v15 = vsel %vm400_vm5, %v380_v37, %v399_v7 }
 0x127   : > { %v367_v14 = vsel %vm366_vm4, %v346_v38, %v365_v10  ;;  %v404_v21 = vsel %vm402_vm7, %v403_v17, %v401_v15  ;;  %v420_v24 = vsel %vm418_vm8, %v409_v20, 0.0 }
 0x128   : > { %v370_v16 = vsel %vm368_vm6, %v369_v12, %v367_v14  ;;  %v423_v26 = vsel %vm422_vm10, %v420_v24, 0.0 }
 0x129   : > { %v406_v19 = vadd.f32 1.0, %v370_v16 }
 0x12b   : > { %v408_v22 = vsub.f32 %v406_v19, %v404_v21 }
 0x12d   : > { %v410_v23 = vmax.f32 %v408_v22, 0.0 }
 0x12f   : > { %v421_v25 = vsel %vm419_vm9, %v410_v23, 0.0 }
 0x130   : > { %v424_v27 = vsel %vm422_vm10, %v421_v25, 0.0 }
 0x131   : > { %v425_v28 = vadd.f32 %v424_v27, %v423_v26 }
 0x133   : > { %426 = vadd.xlane.f32.xlu2 %v425_v28 }
 0x1a6   : > { %v427_v29 = vpop.xlane.xlu2 %426 }
 0x1a7   : > { %v428_v30 = vrot.slane %v427_v29, 4 }
 0x1a9   : > { %v429_v31 = vadd.f32 %v428_v30, %v427_v29 }
 0x1ab   : > { %v430_v32 = vrot.slane %v429_v31, 2 }
 0x1ad   : > { %v431_v33 = vadd.f32 %v430_v32, %v429_v31 }
 0x1af   : > { %v432_v34 = vrot.slane %v431_v33, 1 }
 0x1b1   : > { %v433_v35 = vadd.f32 %v432_v34, %v431_v33 }
 0x1b3   : > { %615 = vpush %v433_v35 }
 0x1e4   : > { %s616_s4 = spop %615 }
 0x1e5   : > { %v435_v36 = vstv %s616_s4 }
 0x1e6   : > { %436 = vst [vmem:[%s298_s29] sm:$0xff] %v435_v36 }
 0x1e7   : > { %817 = shalt.err (!%p814_p2)
}
 0x1e8   : > { %620 = dma.vmem_to_hbm [thread:$0]  (%p939_p9), %s451_s20, 128, %s453_s19, %s438_s27  }
 0x1e9 PF: > { %p626_p3 = scmp.ge.s32.totalorder %s860_s15, 2  ;;  %s464_s26 = sand.u32 1, %s848_s12  }
 0x1ea   : > { %p1152_p4 = scmp.ne.s32.totalorder %s1148_s25, 0  ;;  %s465_s23 = scalar_lea.sflag [#allocation4], %s464_s26 }
 0x1ec   : > { %p623_p13 = pnand %p626_p3, %p1152_p4 }
 0x1ee   : > { %p624_p7 = pneg %p623_p13 }
 0x1f0   : > { %843 = dma.done.wait (%p624_p7), %s465_s23, 128  }
 0x1f1   : > { %845 = vsyncadd (%p624_p7), %s465_s23, 4294967168  ;;  %p19_p8 = scmp.ge.s32.totalorder %s916_s18, 6   ;;  %s1153_s12 = smov %s852_s13 }
 0x1f2   : > { %s1154_s13 = smov %s856_s14  ;;  %s1155_s14 = smov %s928_s21 }
 0x1f3   : > { %s1156_s15 = smov %s916_s18  ;;  %21 = sbr.rel (!%p19_p8) target bundleno = 7 (0x7), region = 101 }
 0x1f8   :  { %471 = vsyncpa [#allocation3], 1 }
 0x1f9   :  { %473 = vsyncpa [#allocation3 + $0x1], 1 }
 0x1fa   :  { %474 = vsyncpa [#allocation6], 1 }
 0x1fb   :  { %476 = vsyncpa [#allocation6 + $0x1], 1 }
 0x1fc   :  { %477 = vsyncpa [#allocation4], 1 }
 0x1fd   :  { %479 = vsyncpa [#allocation4 + $0x1], 1 }

</bundles_post_ra>
